<compile_context>
chip_gen: v5e
topology: v5e:2x2
jax: 0.10.0
libtpu: 0.0.40
codegen_flags: <defaults>
</compile_context>

<pallas_src>
import functools

import jax
import jax.numpy as jnp
from jax.experimental import pallas as pl
from jax.experimental.pallas import tpu as pltpu


def _round_up(x, m):
    return ((x + m - 1) // m) * m


def _choose_tile_b(batch):
    """Batch tile = lane dim of the transposed output block.

    - batch <= 128: a single whole-batch block (grid=(1,)), rounded to 16 rows
      (bf16 packs 16 rows per sublane group).
    - batch  > 128: the output block's lane dim must be a multiple of 128, so
      pick 128 or 256 to minimize padded rows, tie-breaking toward an even
      number of grid steps (keeps both of v7x's TensorCores busy).
    """
    if batch <= 128:
        return _round_up(max(batch, 16), 16)
    best_tile, best_key = None, None
    for tb in (128, 256):
        steps = -(-batch // tb)
        pad = steps * tb - batch
        key = (pad, steps % 2, steps)  # least padding, prefer even, then fewer
        if best_key is None or key < best_key:
            best_tile, best_key = tb, key
    return best_tile


def _mlp_kernel(x_ref, w1_ref, b1_ref, w2_ref, b2_ref, o_ref):
    """out_T = W2 @ relu(W1 @ x_T + b1) + b2, batch on the lane axis."""
    # Transpose + bf16 cast in-kernel (instead of separate XLA passes in the
    # wrapper).  f32 transpose first (universally supported), then cast.
    x_t = x_ref[...].T.astype(w1_ref.dtype)                 # (in_f, tile_b)
    # Hidden layer: bf16 operands on the MXU, f32 accumulate.
    h = jnp.dot(w1_ref[...], x_t,                           # (hidden, tile_b)
                preferred_element_type=jnp.float32)
    # Bias + ReLU in f32 on the VPU (v5e has no bf16 VALU).
    h = jnp.maximum(h + b1_ref[...], 0.0)
    # Output layer: (out_pad8, hidden) @ (hidden, tile_b).
    out = jnp.dot(w2_ref[...], h.astype(w2_ref.dtype),      # (out_p, tile_b)
                  preferred_element_type=jnp.float32)
    # Lane-dense store: last dim of o_ref is the batch tile.
    o_ref[...] = (out + b2_ref[...]).astype(o_ref.dtype)


def _mlp_pallas(x, w1, b1, w2, b2, out_features):
    """Pallas path.  x: (B, in_f) f32; weights already in kernel layout."""
    B, in_f = x.shape
    hidden = w1.shape[0]
    out_p = w2.shape[0]
    out_dtype = x.dtype

    tile_b = _choose_tile_b(B)
    B_pad = _round_up(B, tile_b)
    if B_pad != B:  # pad instead of asserting divisibility
        x = jnp.pad(x, ((0, B_pad - B), (0, 0)))

    grid = (B_pad // tile_b,)

    out_t = pl.pallas_call(
        _mlp_kernel,
        out_shape=jax.ShapeDtypeStruct((out_p, B_pad), out_dtype),
        grid_spec=pltpu.PrefetchScalarGridSpec(
            num_scalar_prefetch=0,
            grid=grid,
            in_specs=[
                # batch-tiled activations (block last dim == full in_f)
                pl.BlockSpec((tile_b, in_f), lambda i: (i, 0)),
                # weights / biases: whole arrays, constant block index
                # -> fetched once, VMEM-resident across the grid.
                pl.BlockSpec((hidden, in_f), lambda i: (0, 0)),
                pl.BlockSpec((hidden, 1), lambda i: (0, 0)),
                pl.BlockSpec((out_p, hidden), lambda i: (0, 0)),
                pl.BlockSpec((out_p, 1), lambda i: (0, 0)),
            ],
            # transposed output: 8 sublanes x batch lanes (lane-dense vst)
            out_specs=pl.BlockSpec((out_p, tile_b), lambda i: (0, i)),
        ),
        compiler_params=pltpu.CompilerParams(
            dimension_semantics=("parallel",)),
    )(x, w1, b1, w2, b2)

    # (out_p, B_pad) -> (B, out_features); only out_p=8 rows, so this is tiny.
    return out_t[:out_features, :B].T


def _mlp_xla(x, w1, b1, w2, b2, out_features):
    """Plain fused XLA path for tiny batches (launch cost dominates there)."""
    h = jnp.maximum(
        jnp.dot(x.astype(w1.dtype), w1.T, preferred_element_type=jnp.float32)
        + b1[:, 0], 0.0)
    out = (jnp.dot(h.astype(w2.dtype), w2.T, preferred_element_type=jnp.float32)
           + b2[:, 0])
    return out[:, :out_features].astype(x.dtype)


def snake_mlp(x, w1, b1, w2, b2, *, out_features, use_pallas=None):
    """Forward pass of Model: Linear(in, hidden) -> ReLU -> Linear(hidden, out).

    x : (B, input_size) float32
    w1: (hidden, input_size)      bf16, PyTorch layout      (from prepare_params)
    b1: (hidden, 1)               f32
    w2: (out_pad8, hidden)        bf16, rows padded to 8
    b2: (out_pad8, 1)             f32
    out_features: true (unpadded) output size — Python int (static).
    """
    if use_pallas is None:
        use_pallas = x.shape[0] > 64
    if not use_pallas:
        return _mlp_xla(x, w1, b1, w2, b2, out_features)
    return _mlp_pallas(x, w1, b1, w2, b2, out_features)


def init_params(key, input_size, hidden_size=256, output_size=3):
    """nn.Linear-style init, PyTorch layout: weight (out_features, in_features)."""
    k1, k2, k3, k4 = jax.random.split(key, 4)
    bound1 = 1.0 / jnp.sqrt(input_size)
    bound2 = 1.0 / jnp.sqrt(hidden_size)
    w1 = jax.random.uniform(k1, (hidden_size, input_size), jnp.float32, -bound1, bound1)
    b1 = jax.random.uniform(k2, (hidden_size,), jnp.float32, -bound1, bound1)
    w2 = jax.random.uniform(k3, (output_size, hidden_size), jnp.float32, -bound2, bound2)
    b2 = jax.random.uniform(k4, (output_size,), jnp.float32, -bound2, bound2)
    return w1, b1, w2, b2


def prepare_params(w1, b1, w2, b2, *, matmul_dtype=jnp.bfloat16):
    """One-time conversion of PyTorch-layout params into the kernel layout.

    Hoists the bf16 casts and the 8-row output padding out of the per-call
    path entirely (they were separate per-call XLA passes before).
    """
    hidden, _ = w1.shape
    out_f = int(w2.shape[0])
    out_p = _round_up(out_f, 8)  # sublane-pad the tiny output dim
    w1k = jnp.asarray(w1, matmul_dtype)                        # (hidden, in_f)
    b1k = jnp.asarray(b1, jnp.float32).reshape(hidden, 1)      # (hidden, 1)
    w2k = jnp.zeros((out_p, hidden), matmul_dtype).at[:out_f].set(
        jnp.asarray(w2, matmul_dtype))                         # (out_p, hidden)
    b2k = jnp.zeros((out_p, 1), jnp.float32).at[:out_f, 0].set(
        jnp.asarray(b2, jnp.float32))                          # (out_p, 1)
    return {"w1": w1k, "b1": b1k, "w2": w2k, "b2": b2k, "out_features": out_f}


if __name__ == "__main__":
    key = jax.random.PRNGKey(0)
    kx, kp, kx2 = jax.random.split(key, 3)

    input_size = 32      # snake game state vector length
    hidden_size = 256
    output_size = 3

    w1_pt, b1_pt, w2_pt, b2_pt = init_params(kp, input_size, hidden_size, output_size)
    params = prepare_params(w1_pt, b1_pt, w2_pt, b2_pt)

    def ref(x):
        return jnp.maximum(x @ w1_pt.T + b1_pt, 0.0) @ w2_pt.T + b2_pt

    fwd = jax.jit(functools.partial(
        snake_mlp, out_features=params["out_features"]))
    fwd_pallas = jax.jit(functools.partial(
        snake_mlp, out_features=params["out_features"], use_pallas=True))

    # --- tiny batch, forced through the Pallas kernel: grid=(1,), tile=16 ---
    x_small = jax.random.normal(kx, (8, input_size), jnp.float32)
    out_small = jax.block_until_ready(
        fwd_pallas(x_small, params["w1"], params["b1"], params["w2"], params["b2"]))
    assert out_small.shape == (8, output_size)
    assert jnp.allclose(out_small, ref(x_small), atol=2e-2, rtol=2e-2), \
        "small-batch pallas mismatch"

    # --- tiny batch via auto-dispatch (fused XLA path) -----------------------
    out_small2 = jax.block_until_ready(
        fwd(x_small, params["w1"], params["b1"], params["w2"], params["b2"]))
    assert jnp.allclose(out_small2, ref(x_small), atol=2e-2, rtol=2e-2), \
        "small-batch xla mismatch"

    # --- non-multiple batch: tile_b=128, padded 300 -> 384, grid=(3,) --------
    x_big = jax.random.normal(kx2, (300, input_size), jnp.float32)
    out_big = jax.block_until_ready(
        fwd(x_big, params["w1"], params["b1"], params["w2"], params["b2"]))
    assert out_big.shape == (300, output_size)
    assert jnp.allclose(out_big, ref(x_big), atol=2e-2, rtol=2e-2), \
        "tiled-batch mismatch"

    print("KERNEL_OK")
</pallas_src>

<mosaic_0001>
module attributes {stable_mosaic.version = 11 : i64} {
  func.func @_mlp_kernel(%arg0: i32, %arg1: memref<16x32xf32, #tpu.memory_space<vmem>>, %arg2: memref<256x32xbf16, #tpu.memory_space<vmem>>, %arg3: memref<256x1xf32, #tpu.memory_space<vmem>>, %arg4: memref<8x256xbf16, #tpu.memory_space<vmem>>, %arg5: memref<8x1xf32, #tpu.memory_space<vmem>>, %arg6: memref<8x16xf32, #tpu.memory_space<vmem>>) attributes {dimension_semantics = [#tpu.dimension_semantics<parallel>], iteration_bounds = array<i64: 1>, scalar_prefetch = 0 : i64, scratch_operands = 0 : i64, tpu.core_type = #tpu.core_type<tc>, window_params = [{transform_indices = @transform_0, window_bounds = array<i64: 16, 32>}, {pipeline_mode = #tpu.pipeline_mode<synchronous>, transform_indices = @transform_1, window_bounds = array<i64: 256, 32>}, {pipeline_mode = #tpu.pipeline_mode<synchronous>, transform_indices = @transform_2, window_bounds = array<i64: 256, 1>}, {pipeline_mode = #tpu.pipeline_mode<synchronous>, transform_indices = @transform_3, window_bounds = array<i64: 8, 256>}, {pipeline_mode = #tpu.pipeline_mode<synchronous>, transform_indices = @transform_4, window_bounds = array<i64: 8, 1>}, {transform_indices = @transform_5, window_bounds = array<i64: 8, 16>}]} {
    %c0 = arith.constant 0 : index
    %c0_0 = arith.constant 0 : index
    %0 = vector.load %arg1[%c0, %c0_0] : memref<16x32xf32, #tpu.memory_space<vmem>>, vector<16x32xf32>
    %1 = tpu.transpose %0, [1, 0] : vector<16x32xf32> -> vector<32x16xf32>
    %2 = arith.truncf %1 : vector<32x16xf32> to vector<32x16xbf16>
    %c0_1 = arith.constant 0 : index
    %c0_2 = arith.constant 0 : index
    %3 = vector.load %arg2[%c0_1, %c0_2] : memref<256x32xbf16, #tpu.memory_space<vmem>>, vector<256x32xbf16>
    %cst = arith.constant dense<0.000000e+00> : vector<256x16xf32>
    %4 = tpu.matmul %3, %2, %cst {dimension_numbers = #tpu.dot_dimension_numbers<[1], [0], [0], [1], [0, 0, 1, 1], [], []>} : vector<256x32xbf16>, vector<32x16xbf16>, vector<256x16xf32> -> vector<256x16xf32>
    %c0_3 = arith.constant 0 : index
    %c0_4 = arith.constant 0 : index
    %5 = vector.load %arg3[%c0_3, %c0_4] : memref<256x1xf32, #tpu.memory_space<vmem>>, vector<256x1xf32>
    %6 = vector.broadcast %5 : vector<256x1xf32> to vector<256x16xf32>
    %7 = arith.addf %4, %6 : vector<256x16xf32>
    %cst_5 = arith.constant 0.000000e+00 : f32
    %8 = vector.broadcast %cst_5 : f32 to vector<256x16xf32>
    %9 = arith.maximumf %7, %8 : vector<256x16xf32>
    %c0_6 = arith.constant 0 : index
    %c0_7 = arith.constant 0 : index
    %10 = vector.load %arg4[%c0_6, %c0_7] : memref<8x256xbf16, #tpu.memory_space<vmem>>, vector<8x256xbf16>
    %11 = arith.truncf %9 : vector<256x16xf32> to vector<256x16xbf16>
    %cst_8 = arith.constant dense<0.000000e+00> : vector<8x16xf32>
    %12 = tpu.matmul %10, %11, %cst_8 {dimension_numbers = #tpu.dot_dimension_numbers<[1], [0], [0], [1], [0, 0, 1, 1], [], []>} : vector<8x256xbf16>, vector<256x16xbf16>, vector<8x16xf32> -> vector<8x16xf32>
    %c0_9 = arith.constant 0 : index
    %c0_10 = arith.constant 0 : index
    %13 = vector.load %arg5[%c0_9, %c0_10] : memref<8x1xf32, #tpu.memory_space<vmem>>, vector<8x1xf32>
    %14 = vector.broadcast %13 : vector<8x1xf32> to vector<8x16xf32>
    %15 = arith.addf %12, %14 : vector<8x16xf32>
    %c0_11 = arith.constant 0 : index
    %c0_12 = arith.constant 0 : index
    %16 = vector.load %arg6[%c0_11, %c0_12] : memref<8x16xf32, #tpu.memory_space<vmem>>, vector<8x16xf32>
    tpu.vector_store %arg6[%c0_11, %c0_12], %15 {strides = array<i32>} : memref<8x16xf32, #tpu.memory_space<vmem>>, vector<8x16xf32>,
    return
  }
  func.func @transform_0(%arg0: i32) -> (i32, i32) {
    %c0_i32 = arith.constant 0 : i32
    %c0_i32_0 = arith.constant 0 : i32
    return %arg0, %c0_i32 : i32, i32
  }
  func.func @transform_1(%arg0: i32) -> (i32, i32) {
    %c0_i32 = arith.constant 0 : i32
    %c0_i32_0 = arith.constant 0 : i32
    %c0_i32_1 = arith.constant 0 : i32
    return %c0_i32, %c0_i32_0 : i32, i32
  }
  func.func @transform_2(%arg0: i32) -> (i32, i32) {
    %c0_i32 = arith.constant 0 : i32
    %c0_i32_0 = arith.constant 0 : i32
    %c0_i32_1 = arith.constant 0 : i32
    return %c0_i32, %c0_i32_0 : i32, i32
  }
  func.func @transform_3(%arg0: i32) -> (i32, i32) {
    %c0_i32 = arith.constant 0 : i32
    %c0_i32_0 = arith.constant 0 : i32
    %c0_i32_1 = arith.constant 0 : i32
    return %c0_i32, %c0_i32_0 : i32, i32
  }
  func.func @transform_4(%arg0: i32) -> (i32, i32) {
    %c0_i32 = arith.constant 0 : i32
    %c0_i32_0 = arith.constant 0 : i32
    %c0_i32_1 = arith.constant 0 : i32
    return %c0_i32, %c0_i32_0 : i32, i32
  }
  func.func @transform_5(%arg0: i32) -> (i32, i32) {
    %c0_i32 = arith.constant 0 : i32
    %c0_i32_0 = arith.constant 0 : i32
    return %c0_i32, %arg0 : i32, i32
  }
}

</mosaic_0001>

<bundles_post_ra>
// kernel: snake_mlp.1
= control target key start
LH: loop header
LB: loop body
LE: loop exit
PB: predicated region body
PF: predicated region fallthrough
CT: control target
= control target key end

     0   :  { %v698_v1 = vmov 0   ;;  %vm361_vm0 = vcmask 261120   ;;  %vm587_vm1 = vcmask 130048   ;;  %s997_s0 = inlined_call_operand.vmem [shape: f32[16,32], index: 0, kind: input, shape index: {}]   ;;  %s998_s2 = inlined_call_operand.vmem [shape: f32[256,1], index: 2, kind: input, shape index: {}]   ;;  %s999_s1 = inlined_call_operand.vmem [shape: bf16[256,32], index: 1, kind: input, shape index: {}]   ;;  %s1000_s4 = inlined_call_operand.vmem [shape: f32[8,1], index: 4, kind: input, shape index: {}]   ;;  %s1001_s3 = inlined_call_operand.vmem [shape: bf16[8,256], index: 3, kind: input, shape index: {}]   ;;  %s1002_s5 = inlined_call_operand.vmem [shape: f32[8,16], index: 5, kind: output, shape index: {}]  }
   0x1   :  { %v21_v0 = vld [vmem:[%s997_s0] sm:$0xff]  ;;  %695 = vset.pattern.permute.xlu1 %v698_v1  ;;  %696 = vset.pattern.permute.xlu2 %v698_v1  ;;  %v120_v3 = vld [vmem:[%s998_s2 + $0xf8] sm:$0xff]  ;;  %v22_v4 = vld [vmem:[%s997_s0 + $0x8] sm:$0xff] }
   0x2   :  { %v89_v2 = vld [vmem:[%s998_s2] sm:$0xff]  ;;  %23 = vxpose.xlu0.b32.start [1/2] (short) (narrow) %v21_v0, 32  ;;  %278 = vperm.xlu2 %696, %v120_v3   ;;  %v119_v5 = vld [vmem:[%s998_s2 + $0xf0] sm:$0xff]  ;;  %v104_v8 = vld [vmem:[%s998_s2 + $0x78] sm:$0xff] }
   0x3   :  { %123 = vperm.xlu1 %695, %v89_v2   ;;  %v117_v6 = vld [vmem:[%s998_s2 + $0xe0] sm:$0xff]  ;;  %v103_v7 = vld [vmem:[%s998_s2 + $0x70] sm:$0xff]  ;;  %v116_v10 = vld [vmem:[%s998_s2 + $0xd8] sm:$0xff] }
   0x4   :  { %v115_v9 = vld [vmem:[%s998_s2 + $0xd0] sm:$0xff]  ;;  %v101_v11 = vld [vmem:[%s998_s2 + $0x60] sm:$0xff]  ;;  %v102_v12 = vld [vmem:[%s998_s2 + $0x68] sm:$0xff] }
   0x5   :  { %v113_v13 = vld [vmem:[%s998_s2 + $0xc0] sm:$0xff]  ;;  %v99_v14 = vld [vmem:[%s998_s2 + $0x50] sm:$0xff]  ;;  %v114_v17 = vld [vmem:[%s998_s2 + $0xc8] sm:$0xff] }
   0x6   :  { %v111_v15 = vld [vmem:[%s998_s2 + $0xb0] sm:$0xff]  ;;  %v97_v16 = vld [vmem:[%s998_s2 + $0x40] sm:$0xff]  ;;  %v100_v19 = vld [vmem:[%s998_s2 + $0x58] sm:$0xff] }
   0x7   :  { %v109_v18 = vld [vmem:[%s998_s2 + $0xa0] sm:$0xff]  ;;  %v95_v20 = vld [vmem:[%s998_s2 + $0x30] sm:$0xff]  ;;  %v112_v21 = vld [vmem:[%s998_s2 + $0xb8] sm:$0xff] }
   0x8   :  { %v107_v22 = vld [vmem:[%s998_s2 + $0x90] sm:$0xff]  ;;  %v98_v23 = vld [vmem:[%s998_s2 + $0x48] sm:$0xff]  ;;  %v93_v24 = vld [vmem:[%s998_s2 + $0x20] sm:$0xff] }
   0x9   :  { %v110_v25 = vld [vmem:[%s998_s2 + $0xa8] sm:$0xff]  ;;  %v105_v26 = vld [vmem:[%s998_s2 + $0x80] sm:$0xff]  ;;  %v96_v27 = vld [vmem:[%s998_s2 + $0x38] sm:$0xff] }
   0xa   :  { %24 = vxpose.xlu0.b32.end [2/2] (short) (narrow) %v22_v4, 32  ;;  %263 = vperm.xlu2 %696, %v117_v6   ;;  %v91_v28 = vld [vmem:[%s998_s2 + $0x10] sm:$0xff]  ;;  %v108_v30 = vld [vmem:[%s998_s2 + $0x98] sm:$0xff]  ;;  %v90_v31 = vld [vmem:[%s998_s2 + $0x8] sm:$0xff] }
   0xb   :  { %273 = vperm.xlu1 %695, %v119_v5   ;;  %v94_v33 = vld [vmem:[%s998_s2 + $0x28] sm:$0xff]  ;;  %v92_v39 = vld [vmem:[%s998_s2 + $0x18] sm:$0xff]  ;;  %v673_v42 = vld [vmem:[%s999_s1] sm:$0xff] }
   0xc   :  { %v106_v36 = vld [vmem:[%s998_s2 + $0x88] sm:$0xff]  ;;  %v679_v43 = vld [vmem:[%s999_s1 + $0x30] sm:$0xff]  ;;  %v684_v44 = vld [vmem:[%s999_s1 + $0x58] sm:$0xff] }
   0xd   :  { %v548_v45 = vld [vmem:[%s1000_s4] sm:$0xff]  ;;  %v674_v48 = vld [vmem:[%s999_s1 + $0x8] sm:$0xff]  ;;  %v680_v49 = vld [vmem:[%s999_s1 + $0x38] sm:$0xff] }
   0xe   :  { %v685_v51 = vld [vmem:[%s999_s1 + $0x60] sm:$0xff]  ;;  %v675_v54 = vld [vmem:[%s999_s1 + $0x10] sm:$0xff]  ;;  %v686_v57 = vld [vmem:[%s999_s1 + $0x68] sm:$0xff] }
   0xf   :  { %v681_v55 = vld [vmem:[%s999_s1 + $0x40] sm:$0xff]  ;;  %v118_v59 = vld [vmem:[%s998_s2 + $0xe8] sm:$0xff]  ;;  %v676_v62 = vld [vmem:[%s999_s1 + $0x18] sm:$0xff] }
  0x10   :  { %v682_v63 = vld [vmem:[%s999_s1 + $0x48] sm:$0xff]  ;;  %v687_v0 = vld [vmem:[%s999_s1 + $0x70] sm:$0xff]  ;;  %v677_v4 = vld [vmem:[%s999_s1 + $0x20] sm:$0xff] }
  0x11   :  { %v683_v5 = vld [vmem:[%s999_s1 + $0x50] sm:$0xff]  ;;  %v688_v6 = vld [vmem:[%s999_s1 + $0x78] sm:$0xff] }
  0x12   :  { %198 = vperm.xlu2 %696, %v104_v8  }
  0x13   :  { %193 = vperm.xlu1 %695, %v103_v7  }
  0x1a   :  { %258 = vperm.xlu2 %696, %v116_v10   ;;  %v678_v10 = vld [vmem:[%s999_s1 + $0x28] sm:$0xff] }
  0x1b   :  { %253 = vperm.xlu1 %695, %v115_v9  }
  0x22   :  { %188 = vperm.xlu2 %696, %v102_v12  }
  0x23   :  { %183 = vperm.xlu1 %695, %v101_v11  }
  0x2a   :  { %248 = vperm.xlu2 %696, %v114_v17  }
  0x2b   :  { %243 = vperm.xlu1 %695, %v113_v13  }
  0x32   :  { %178 = vperm.xlu2 %696, %v100_v19  }
  0x33   :  { %173 = vperm.xlu1 %695, %v99_v14  }
  0x3a   :  { %238 = vperm.xlu2 %696, %v112_v21  }
  0x3b   :  { %233 = vperm.xlu1 %695, %v111_v15  }
  0x42   :  { %168 = vperm.xlu2 %696, %v98_v23  }
  0x43   :  { %163 = vperm.xlu1 %695, %v97_v16  }
  0x4a   :  { %228 = vperm.xlu2 %696, %v110_v25  }
  0x4b   :  { %223 = vperm.xlu1 %695, %v109_v18  }
  0x52   :  { %158 = vperm.xlu2 %696, %v96_v27  }
  0x53   :  { %153 = vperm.xlu1 %695, %v95_v20  }
  0x5a   :  { %218 = vperm.xlu2 %696, %v108_v30  }
  0x5b   :  { %213 = vperm.xlu1 %695, %v107_v22  }
  0x5c   :  { %v849_v47 = vpop.permute.xlu2 %278 }
  0x62   :  { %148 = vperm.xlu2 %696, %v94_v33  }
  0x63   :  { %143 = vperm.xlu1 %695, %v93_v24  }
  0x64   :  { %v865_v52 = vpop.permute.xlu2 %263 }
  0x6a   :  { %208 = vperm.xlu2 %696, %v106_v36  }
  0x6b   :  { %203 = vperm.xlu1 %695, %v105_v26  }
  0x6c   :  { %v875_v56 = vpop.permute.xlu2 %198 }
  0x71   :  { %697 = vset.pattern.permute.xlu0 %v698_v1 }
  0x72   :  { %138 = vperm.xlu2 %696, %v92_v39  }
  0x73   :  { %133 = vperm.xlu1 %695, %v91_v28  }
  0x74   :  { %v888_v60 = vpop.permute.xlu2 %258 }
  0x75   :  { %v822_v35 = vpop.permute.xlu1 %123 }
  0x7a   :  { %551 = vperm.xlu2 %696, %v548_v45  }
  0x7b   :  { %128 = vperm.xlu1 %695, %v90_v31  }
  0x7c   :  { %v189_v1 = vpop.permute.xlu2 %188 }
  0x7d   :  { %v830_v40 = vpop.permute.xlu1 %273 }
  0x84   :  { %v904_v3 = vpop.permute.xlu2 %248 }
  0x85   :  { %v847_v46 = vpop.permute.xlu1 %193 }
  0x88   :  { %268 = vperm.xlu0 %697, %v118_v59  }
  0x8c   :  { %v920_v8 = vpop.permute.xlu2 %178 }
  0x8d   :  { %v857_v50 = vpop.permute.xlu1 %253 }
  0x94   :  { %v239_v11 = vpop.permute.xlu2 %238 }
  0x95   :  { %v867_v53 = vpop.permute.xlu1 %183 }
  0x9c   :  { %v930_v13 = vpop.permute.xlu2 %168 }
  0x9d   :  { %v882_v58 = vpop.permute.xlu1 %243 }
  0xa4   :  { %v934_v15 = vpop.permute.xlu2 %228 }
  0xa5   :  { %v890_v61 = vpop.permute.xlu1 %173 }
  0xa6   :  { %v39_v29 = vpop.trf.xlu0 }
  0xac   :  { %v938_v17 = vpop.permute.xlu2 %158 }
  0xad   :  { %v234_v2 = vpop.permute.xlu1 %233 }
  0xae   :  { %v40_v32 = vpop.trf.xlu0 }
  0xaf   :  { %v55_v41 = vpack.c.bf16 %v40_v32, %v39_v29 }
  0xb4   :  { %v942_v19 = vpop.permute.xlu2 %218 }
  0xb5   :  { %v915_v7 = vpop.permute.xlu1 %163 }
  0xb6   :  { %v41_v34 = vpop.trf.xlu0 }
  0xbc   :  { %v944_v23 = vpop.permute.xlu2 %148 }
  0xbd   :  { %v922_v9 = vpop.permute.xlu1 %223 }
  0xbe   :  { %v42_v37 = vpop.trf.xlu0 }
  0xbf   :  { %v56_v38 = vpack.c.bf16 %v42_v37, %v41_v34 }
  0xc1   :  { %416 = vmatpush.bf16.msra.mxu0 %v56_v38  ;;  %689 = vmatpush.bf16.msra.mxu1 %v56_v38 }
  0xc2   :  { %690 = vmatpush.bf16.msra.mxu3 %v56_v38 }
  0xc4   :  { %v947_v32 = vpop.permute.xlu2 %208 }
  0xc5   :  { %417 = vmatpush.bf16.msra.mxu0 %v55_v41  ;;  %691 = vmatpush.bf16.msra.mxu1 %v55_v41  ;;  %v928_v12 = vpop.permute.xlu1 %153 }
  0xc6   :  { %692 = vmatpush.bf16.msra.mxu3 %v55_v41 }
  0xc8   :  { %657 = vmatmul.msk.bf16.vlgmr.msra.gmra.mxu0 %vm361_vm0, %v673_v42  ;;  %663 = vmatmul.msk.bf16.vlgmr.msra.gmra.mxu1 %vm361_vm0, %v679_v43 }
  0xc9   :  { %668 = vmatmul.msk.bf16.vlgmr.msra.gmra.mxu3 %vm361_vm0, %v684_v44 }
  0xcd   :  { %v932_v14 = vpop.permute.xlu1 %213 }
  0xd5   :  { %v936_v16 = vpop.permute.xlu1 %143 }
  0xd8   :  { %658 = vmatmul.msk.bf16.gmra.mxu0 %vm361_vm0, %v674_v48  ;;  %664 = vmatmul.msk.bf16.gmra.mxu1 %vm361_vm0, %v680_v49 }
  0xd9   :  { %669 = vmatmul.msk.bf16.gmra.mxu3 %vm361_vm0, %v685_v51 }
  0xdd   :  { %v940_v18 = vpop.permute.xlu1 %203 }
  0xe5   :  { %v134_v20 = vpop.permute.xlu1 %133 }
  0xe8   :  { %659 = vmatmul.msk.bf16.gmra.mxu0 %vm361_vm0, %v675_v54  ;;  %665 = vmatmul.msk.bf16.gmra.mxu1 %vm361_vm0, %v681_v55 }
  0xe9   :  { %670 = vmatmul.msk.bf16.gmra.mxu3 %vm361_vm0, %v686_v57 }
  0xed   :  { %v129_v26 = vpop.permute.xlu1 %128 }
  0xf8   :  { %660 = vmatmul.msk.bf16.gmra.mxu0 %vm361_vm0, %v676_v62  ;;  %666 = vmatmul.msk.bf16.gmra.mxu1 %vm361_vm0, %v682_v63 }
  0xf9   :  { %671 = vmatmul.msk.bf16.gmra.mxu3 %vm361_vm0, %v687_v0 }
 0x108   :  { %661 = vmatmul.msk.bf16.gmra.mxu0 %vm361_vm0, %v677_v4  ;;  %667 = vmatmul.msk.bf16.gmra.mxu1 %vm361_vm0, %v683_v5 }
 0x109   :  { %672 = vmatmul.msk.bf16.gmra.mxu3 %vm361_vm0, %v688_v6 }
 0x118   :  { %662 = vmatmul.msk.bf16.gmra.mxu0 %vm361_vm0, %v678_v10 }
 0x145   :  { %v419_v21 = vpop.f32.mrf.mxu0  ;;  %v449_v22 = vpop.f32.mrf.mxu1 }
 0x146   :  { %v420_v24 = vadd.f32 %v419_v21, %v822_v35  ;;  %v139_v35 = vpop.permute.xlu2 %138  ;;  %v450_v59 = vadd.f32 %v449_v22, %v867_v53 }
 0x148   :  { %v499_v30 = vmax.f32 %v420_v24, 0.0  ;;  %v511_v10 = vmax.f32 %v450_v59, 0.0 }
 0x14c   :  { %v474_v25 = vpop.f32.mrf.mxu3 }
 0x14d   :  { %v421_v27 = vpop.f32.mrf.mxu0  ;;  %v451_v28 = vpop.f32.mrf.mxu1  ;;  %v475_v34 = vadd.f32 %v474_v25, %v234_v2 }
 0x14e   :  { %v422_v29 = vadd.f32 %v421_v27, %v129_v26  ;;  %v452_v54 = vadd.f32 %v451_v28, %v189_v1 }
 0x14f   :  { %v521_v41 = vmax.f32 %v475_v34, 0.0 }
 0x150   :  { %v500_v31 = vmax.f32 %v422_v29, 0.0  ;;  %v512_v4 = vmax.f32 %v452_v54, 0.0 }
 0x152   :  { %v949_v33 = vpack.c.bf16 %v500_v31, %v499_v30 }
 0x154   :  { %v476_v36 = vpop.f32.mrf.mxu3 }
 0x155   :  { %v477_v37 = vadd.f32 %v476_v36, %v239_v11  ;;  %v424_v38 = vpop.f32.mrf.mxu0  ;;  %v454_v39 = vpop.f32.mrf.mxu1 }
 0x156   :  { %v425_v44 = vadd.f32 %v424_v38, %v134_v20  ;;  %v455_v45 = vadd.f32 %v454_v39, %v847_v46  ;;  %v538_v20 = vpack.c.bf16 %v512_v4, %v511_v10  ;;  %v269_v36 = vpop.permute.xlu0 %268 }
 0x157   :  { %v522_v42 = vmax.f32 %v477_v37, 0.0 }
 0x158   :  { %v501_v62 = vmax.f32 %v425_v44, 0.0  ;;  %v513_v63 = vmax.f32 %v455_v45, 0.0 }
 0x159   :  { %v951_v43 = vpack.c.bf16 %v522_v42, %v521_v41 }
 0x15c   :  { %v479_v48 = vpop.f32.mrf.mxu3 }
 0x15d   :  { %v426_v49 = vpop.f32.mrf.mxu0  ;;  %v456_v51 = vpop.f32.mrf.mxu1  ;;  %v480_v4 = vadd.f32 %v479_v48, %v882_v58 }
 0x15e   :  { %v427_v55 = vadd.f32 %v426_v49, %v139_v35  ;;  %v457_v57 = vadd.f32 %v456_v51, %v875_v56 }
 0x160   :  { %v502_v0 = vmax.f32 %v427_v55, 0.0  ;;  %v514_v2 = vmax.f32 %v457_v57, 0.0 }
 0x162   :  { %v539_v5 = vpack.c.bf16 %v514_v2, %v513_v63  ;;  %v956_v6 = vpack.c.bf16 %v502_v0, %v501_v62 }
 0x164   :  { %v481_v11 = vpop.f32.mrf.mxu3  ;;  %561 = vmatpush.bf16.msrb.mxu1 %v539_v5 }
 0x165   :  { %v958_v46 = vpop.f32.mrf.mxu0  ;;  %v960_v56 = vpop.f32.mrf.mxu1  ;;  %v482_v62 = vadd.f32 %v481_v11, %v904_v3 }
 0x168   :  { %562 = vmatpush.bf16.msrb.mxu1 %v538_v20  ;;  %v524_v20 = vmax.f32 %v482_v62, 0.0 }
 0x16c   :  { %v484_v1 = vpop.f32.mrf.mxu3 }
 0x16d   :  { %v431_v21 = vpop.f32.mrf.mxu0  ;;  %v962_v24 = vpop.f32.mrf.mxu1  ;;  %v485_v57 = vadd.f32 %v484_v1, %v857_v50 }
 0x174   :  { %v486_v53 = vpop.f32.mrf.mxu3 }
 0x175   :  { %v434_v22 = vpop.f32.mrf.mxu0  ;;  %v464_v27 = vpop.f32.mrf.mxu1  ;;  %v487_v51 = vadd.f32 %v486_v53, %v888_v60  ;;  %v525_v60 = vmax.f32 %v485_v57, 0.0 }
 0x177   :  { %v526_v63 = vmax.f32 %v487_v51, 0.0 }
 0x179   :  { %v545_v1 = vpack.c.bf16 %v526_v63, %v525_v60 }
 0x17c   :  { %v489_v25 = vpop.f32.mrf.mxu3 }
 0x17d   :  { %v436_v26 = vpop.f32.mrf.mxu0  ;;  %v466_v34 = vpop.f32.mrf.mxu1  ;;  %v490_v35 = vadd.f32 %v489_v25, %v865_v52  ;;  %v523_v25 = vmax.f32 %v480_v4, 0.0 }
 0x17f   :  { %v527_v59 = vmax.f32 %v490_v35, 0.0  ;;  %v544_v48 = vpack.c.bf16 %v524_v20, %v523_v25 }
 0x184   :  { %v491_v28 = vpop.f32.mrf.mxu3 }
 0x185   :  { %v439_v29 = vpop.f32.mrf.mxu0  ;;  %v492_v39 = vadd.f32 %v491_v28, %v269_v36  ;;  %v469_v49 = vpop.f32.mrf.mxu1 }
 0x186   :  { %v440_v5 = vadd.f32 %v439_v29, %v915_v7  ;;  %v432_v7 = vadd.f32 %v431_v21, %v944_v23 }
 0x187   :  { %v528_v54 = vmax.f32 %v492_v39, 0.0 }
 0x189   :  { %v546_v0 = vpack.c.bf16 %v528_v54, %v527_v59 }
 0x18c   :  { %v494_v30 = vpop.f32.mrf.mxu3 }
 0x18d   :  { %v441_v31 = vpop.f32.mrf.mxu0  ;;  %v495_v37 = vadd.f32 %v494_v30, %v830_v40  ;;  %v471_v11 = vpop.f32.mrf.mxu1  ;;  %v470_v30 = vadd.f32 %v469_v49, %v922_v9  ;;  %v462_v9 = vadd.f32 %v962_v24, %v947_v32 }
 0x18e   :  { %v442_v52 = vadd.f32 %v441_v31, %v930_v13  ;;  %v435_v13 = vadd.f32 %v434_v22, %v928_v12  ;;  %v472_v58 = vadd.f32 %v471_v11, %v934_v15  ;;  %v467_v31 = vadd.f32 %v466_v34, %v942_v19 }
 0x18f   :  { %v529_v44 = vmax.f32 %v495_v37, 0.0  ;;  %v504_v22 = vmax.f32 %v432_v7, 0.0  ;;  %v465_v15 = vadd.f32 %v464_v27, %v932_v14  ;;  %v519_v37 = vmax.f32 %v470_v30, 0.0  ;;  %v531_v14 = vld [vmem:[%s1001_s3] sm:$0xff] }
 0x190   :  { %v508_v3 = vmax.f32 %v442_v52, 0.0  ;;  %v520_v12 = vmax.f32 %v472_v58, 0.0  ;;  %v518_v21 = vmax.f32 %v467_v31, 0.0  ;;  %v516_v27 = vmax.f32 %v462_v9, 0.0 }
 0x191   :  { %v517_v19 = vmax.f32 %v465_v15, 0.0  ;;  %v556_v34 = vunpack.c.h.b16 %v531_v14 }
 0x193   :  { %v558_v24 = vpack.c.b16 %v556_v34, %v556_v34 }
 0x194   :  { %v496_v38 = vpop.f32.mrf.mxu3 }
 0x195   :  { %v497_v41 = vadd.f32 %v496_v38, %v849_v47  ;;  %v444_v42 = vpop.f32.mrf.mxu0  ;;  %v542_v38 = vpack.c.bf16 %v520_v12, %v519_v37 }
 0x196   :  { %v445_v40 = vadd.f32 %v444_v42, %v890_v61  ;;  %v437_v61 = vadd.f32 %v436_v26, %v938_v17  ;;  %v430_v17 = vadd.f32 %v958_v46, %v936_v16  ;;  %v505_v26 = vmax.f32 %v435_v13, 0.0 }
 0x197   :  { %v530_v45 = vmax.f32 %v497_v41, 0.0  ;;  %v460_v46 = vadd.f32 %v960_v56, %v940_v18  ;;  %v555_v41 = vunpack.c.l.b16 %v531_v14  ;;  %v552_v56 = vpop.permute.xlu2 %551 }
 0x198   :  { %v509_v50 = vmax.f32 %v445_v40, 0.0  ;;  %v506_v28 = vmax.f32 %v437_v61, 0.0  ;;  %v503_v23 = vmax.f32 %v430_v17, 0.0 }
 0x199   :  { %v547_v55 = vpack.c.bf16 %v530_v45, %v529_v44  ;;  %v515_v39 = vmax.f32 %v460_v46, 0.0  ;;  %v557_v42 = vpack.c.b16 %v555_v41, %v555_v41 }
 0x19a   :  { %v535_v36 = vpack.c.bf16 %v506_v28, %v505_v26  ;;  %v534_v16 = vpack.c.bf16 %v504_v22, %v503_v23 }
 0x19b   :  { %574 = vmatpush.bf16.msra.mxu2 %v547_v55  ;;  %v540_v32 = vpack.c.bf16 %v516_v27, %v515_v39 }
 0x19d   :  { %v446_v47 = vpop.f32.mrf.mxu0 }
 0x19e   :  { %v447_v2 = vadd.f32 %v446_v47, %v920_v8  ;;  %v507_v8 = vmax.f32 %v440_v5, 0.0 }
 0x19f   :  { %575 = vmatpush.bf16.msra.mxu2 %v546_v0 }
 0x1a0   :  { %v510_v10 = vmax.f32 %v447_v2, 0.0  ;;  %v536_v29 = vpack.c.bf16 %v508_v3, %v507_v8 }
 0x1a2   :  { %v537_v53 = vpack.c.bf16 %v510_v10, %v509_v50 }
 0x1a3   :  { %576 = vmatpush.bf16.msra.mxu2 %v545_v1 }
 0x1a4   :  { %563 = vmatpush.bf16.msrb.mxu1 %v537_v53 }
 0x1a7   :  { %577 = vmatpush.bf16.msra.mxu2 %v544_v48 }
 0x1a8   :  { %564 = vmatpush.bf16.msrb.mxu1 %v536_v29 }
 0x1ab   :  { %578 = vmatpush.bf16.msra.mxu2 %v951_v43  ;;  %v541_v43 = vpack.c.bf16 %v518_v21, %v517_v19 }
 0x1ac   :  { %565 = vmatpush.bf16.msrb.mxu1 %v535_v36 }
 0x1af   :  { %579 = vmatpush.bf16.msra.mxu2 %v542_v38 }
 0x1b0   :  { %566 = vmatpush.bf16.msrb.mxu1 %v534_v16 }
 0x1b3   :  { %580 = vmatpush.bf16.msra.mxu2 %v541_v43 }
 0x1b4   :  { %567 = vmatpush.bf16.msrb.mxu1 %v956_v6 }
 0x1b7   :  { %581 = vmatpush.bf16.msra.mxu2 %v540_v32 }
 0x1b8   :  { %568 = vmatpush.bf16.msrb.mxu1 %v949_v33 }
 0x1ba   :  { %582 = vmatmul.bf16.vlgmr.msra.gmra.mxu2 %v558_v24 }
 0x1bb   :  { %569 = vmatmul.bf16.vlgmr.msrb.gmra.mxu1 %v557_v42 }
 0x238   :  { %v570_v18 = vpop.f32.mrf.mxu1 }
 0x239   :  { %v571_v35 = vadd.f32 %v570_v18, %v552_v56 }
 0x23d   :  { %v583_v44 = vpop.f32.mrf.mxu2 }
 0x23e   :  { %v584_v45 = vadd.f32 %v583_v44, %v571_v35 }
 0x240   :  { %588 = vst.msk [vmem:[%s1002_s5] sm:$0xff] %vm587_vm1, %v584_v45  ;;  %v572_v49 = vpop.f32.mrf.mxu1 }
 0x245   :  { %v585_v6 = vpop.f32.mrf.mxu2 }

</bundles_post_ra>
